<compile_context>
chip_gen: v6e
topology: v6e:2x2x1
jax: 0.10.0
libtpu: 0.0.40
codegen_flags: <defaults>
</compile_context>

<pallas_src>
import numpy as np
import jax
import jax.numpy as jnp
from jax.experimental import pallas as pl
from jax.experimental.pallas import tpu as pltpu

FC1_UNITS = 256
FC2_UNITS = 128


def _round_up(x, m):
    return ((x + m - 1) // m) * m


def _critic_kernel(s_ref, a_ref,
                   w1_ref, b1_ref,
                   w2s_ref, w2a_ref, b2_ref,
                   w3_ref, b3_ref,
                   out_ref):
    # fc1 + ReLU in f32 on the MXU: [TB, S] @ [S, 256].  K = state_size is
    # tiny, so f32 costs almost nothing and keeps fc1 numerically exact.
    xs = jnp.dot(s_ref[...], w1_ref[...], preferred_element_type=jnp.float32)
    xs = jnp.maximum(xs + b1_ref[...], 0.0)

    # fc2 (xs block) on the MXU in bf16 with f32 accumulation: [TB,256]@[256,128].
    # Weights are stored f32 (PyTorch parity); the bf16 casts are cheap VPU work
    # hidden under the MXU.
    h = jnp.dot(xs.astype(jnp.bfloat16), w2s_ref[...].astype(jnp.bfloat16),
                preferred_element_type=jnp.float32)
    h = h + b2_ref[...]

    # fc2 (action block): K = action_size (e.g. 4) -> unrolled broadcast FMAs on
    # the VPU, accumulated separately so the chain does not serialize against
    # the fc2 MXU result; added to h once.
    a = a_ref[...]          # [TB, A] f32
    w2a = w2a_ref[...]      # [A, 128] f32
    ha = a[:, 0:1] * w2a[0:1, :]
    for k in range(1, w2a.shape[0]):
        ha = ha + a[:, k:k + 1] * w2a[k:k + 1, :]
    h = jnp.maximum(h + ha, 0.0)

    # fc3: N=1 output -> VPU multiply + XLU cross-lane reduce (off the MXU,
    # which is the binding unit here).
    q = jnp.sum(h * w3_ref[...], axis=-1, keepdims=True)   # [TB, 1]
    out_ref[...] = (q + b3_ref[...]).astype(out_ref.dtype)


def _batch_axis_semantics(nb, conservative):
    """Batch axis semantics: plain 'parallel' everywhere; on v7x (2 TensorCores)
    request genuine per-core grid sharding via CORE_PARALLEL."""
    if conservative:
        return ("parallel",)
    core_par = getattr(pltpu, "CORE_PARALLEL", None)
    try:
        kind = jax.devices()[0].device_kind.lower()
    except Exception:
        kind = ""
    if core_par is not None and nb >= 2 and ("v7" in kind or "7x" in kind):
        return (core_par,)
    return ("parallel",)


def _build_critic_call(B_pad, TB, S, A, F1, F2, nb, conservative):
    const = lambda i: (0, 0)   # weights/biases: same block every step -> VMEM resident

    wkwargs = {}
    if (not conservative) and hasattr(pl, "Buffered"):
        # Constant index_map -> one buffer is enough; skip double-buffer rotation.
        wkwargs = dict(pipeline_mode=pl.Buffered(1))

    def wspec(shape):
        return pl.BlockSpec(shape, const, **wkwargs)

    flops = 2 * B_pad * (S * F1 + F1 * F2 + A * F2 + F2)
    bytes_accessed = (B_pad * (S + A + 1) * 4
                      + (S * F1 + F1 + F1 * F2 + A * F2 + F2 + F2 + 1) * 4)

    return pl.pallas_call(
        _critic_kernel,
        out_shape=jax.ShapeDtypeStruct((B_pad, 1), jnp.float32),
        grid=(nb,),
        in_specs=[
            pl.BlockSpec((TB, S), lambda i: (i, 0)),   # states tile
            pl.BlockSpec((TB, A), lambda i: (i, 0)),   # actions tile
            wspec((S, F1)),                            # w1
            wspec((1, F1)),                            # b1
            wspec((F1, F2)),                           # w2 (xs block)
            wspec((A, F2)),                            # w2 (action block)
            wspec((1, F2)),                            # b2
            wspec((1, F2)),                            # w3 row
            wspec((1, 1)),                             # b3
        ],
        # (TB,1) store kept on purpose: fc3 stays off the MXU and a lane-dense
        # (1,TB) block would need a narrow XLU relayout; bytes/step are tiny.
        out_specs=pl.BlockSpec((TB, 1), lambda i: (i, 0)),
        compiler_params=pltpu.CompilerParams(
            dimension_semantics=_batch_axis_semantics(nb, conservative)),
        cost_estimate=pl.CostEstimate(flops=int(flops), transcendentals=0,
                                      bytes_accessed=int(bytes_accessed)),
    )


def critic_forward(states, actions, params, block_batch=1024):
    """states: [B, state_size] f32, actions: [B, action_size] f32 -> [B, 1] f32."""
    w1, b1, w2s, w2a, b2, w3_row, b3 = params
    B, S = states.shape
    A = actions.shape[1]
    F1 = w1.shape[1]
    F2 = w2s.shape[1]

    # Batch tile: 1024 rows by default (amortizes per-step overhead); floor of
    # a multiple of 8 sublanes so tiny batches don't over-pad.
    TB = min(block_batch, _round_up(B, 8))
    B_pad = _round_up(B, TB)
    if B_pad != B:
        # Only executed when B is not a tile multiple; padded rows produce
        # garbage Q values that are discarded by the [:B] slice below.
        states = jnp.pad(states, ((0, B_pad - B), (0, 0)))
        actions = jnp.pad(actions, ((0, B_pad - B), (0, 0)))

    nb = B_pad // TB
    args = (states, actions, w1, b1, w2s, w2a, b2, w3_row, b3)

    try:
        out = _build_critic_call(B_pad, TB, S, A, F1, F2, nb,
                                 conservative=False)(*args)
    except Exception:
        # Fallback: default double-buffered weights + generic "parallel" axis
        # (functionally identical; keeps the script running on any jax/libtpu).
        out = _build_critic_call(B_pad, TB, S, A, F1, F2, nb,
                                 conservative=True)(*args)

    return out[:B]


def init_critic_params(key, state_size, action_size,
                       fc1_units=FC1_UNITS, fc2_units=FC2_UNITS):
    """Deterministic init mirroring the PyTorch module's reset_parameters():
    weights ~ U(-1/sqrt(out_features), +1/sqrt(out_features)) (the reference
    init_limits uses weight.size()[0] == out_features -- including the fc3
    quirk lim=1/sqrt(1)=1), biases keep nn.Linear's default
    U(-1/sqrt(fan_in), +1/sqrt(fan_in)).  All parameters stored f32."""
    ks = jax.random.split(key, 6)

    def u(k, shape, lim):
        return jax.random.uniform(k, shape, jnp.float32, -lim, lim)

    lim1_w = 1.0 / np.sqrt(fc1_units)
    lim1_b = 1.0 / np.sqrt(state_size)
    w1 = u(ks[0], (state_size, fc1_units), lim1_w)
    b1 = u(ks[1], (1, fc1_units), lim1_b)

    fc2_in = fc1_units + action_size
    lim2_w = 1.0 / np.sqrt(fc2_units)
    lim2_b = 1.0 / np.sqrt(fc2_in)
    w2 = u(ks[2], (fc2_in, fc2_units), lim2_w)
    w2s = w2[:fc1_units]          # concat-free split of fc2's weight
    w2a = w2[fc1_units:]
    b2 = u(ks[3], (1, fc2_units), lim2_b)

    lim3_w = 1.0 / np.sqrt(1)     # mirrors the reference init_limits quirk
    lim3_b = 1.0 / np.sqrt(fc2_units)
    w3_row = u(ks[4], (1, fc2_units), lim3_w)   # stored as [1, 128] row
    b3 = u(ks[5], (1, 1), lim3_b)

    return (w1, b1, w2s, w2a, b2, w3_row, b3)


def critic_forward_ref(states, actions, params):
    """Plain-JAX f32 reference matching the PyTorch forward semantics."""
    w1, b1, w2s, w2a, b2, w3_row, b3 = params
    xs = jnp.maximum(states @ w1 + b1, 0.0)
    x = jnp.concatenate([xs, actions], axis=1)
    w2 = jnp.concatenate([w2s, w2a], axis=0)
    x = jnp.maximum(x @ w2 + b2, 0.0)
    return x @ w3_row.T + b3


if __name__ == "__main__":
    batch = 8
    state_size = 32
    action_size = 4

    key = jax.random.PRNGKey(0)
    k_s, k_a, k_p = jax.random.split(key, 3)

    states = jax.random.normal(k_s, (batch, state_size), jnp.float32)
    actions = jax.random.normal(k_a, (batch, action_size), jnp.float32)
    params = init_critic_params(k_p, state_size, action_size)

    q = critic_forward(states, actions, params)
    q = jax.block_until_ready(q)

    q_ref = critic_forward_ref(states, actions, params)
    # fc2 runs in bf16 on the MXU (f32 accumulate) by design -> loose tolerance.
    np.testing.assert_allclose(np.asarray(q), np.asarray(q_ref),
                               rtol=2e-2, atol=2e-2)
    assert q.shape == (batch, 1)
    print("KERNEL_OK")
</pallas_src>

<mosaic_0001>
module attributes {stable_mosaic.version = 11 : i64} {
  func.func @_critic_kernel(%arg0: i32, %arg1: memref<8x32xf32, #tpu.memory_space<vmem>>, %arg2: memref<8x4xf32, #tpu.memory_space<vmem>>, %arg3: memref<32x256xf32, #tpu.memory_space<vmem>>, %arg4: memref<1x256xf32, #tpu.memory_space<vmem>>, %arg5: memref<256x128xf32, #tpu.memory_space<vmem>>, %arg6: memref<4x128xf32, #tpu.memory_space<vmem>>, %arg7: memref<1x128xf32, #tpu.memory_space<vmem>>, %arg8: memref<1x128xf32, #tpu.memory_space<vmem>>, %arg9: memref<1x1xf32, #tpu.memory_space<vmem>>, %arg10: memref<8x1xf32, #tpu.memory_space<vmem>>) attributes {dimension_semantics = [#tpu.dimension_semantics<parallel>], iteration_bounds = array<i64: 1>, scalar_prefetch = 0 : i64, scratch_operands = 0 : i64, tpu.core_type = #tpu.core_type<tc>, window_params = [{transform_indices = @transform_0, window_bounds = array<i64: 8, 32>}, {transform_indices = @transform_1, window_bounds = array<i64: 8, 4>}, {pipeline_mode = #tpu.pipeline_mode<synchronous>, transform_indices = @transform_2, window_bounds = array<i64: 32, 256>}, {pipeline_mode = #tpu.pipeline_mode<synchronous>, transform_indices = @transform_3, window_bounds = array<i64: 1, 256>}, {pipeline_mode = #tpu.pipeline_mode<synchronous>, transform_indices = @transform_4, window_bounds = array<i64: 256, 128>}, {pipeline_mode = #tpu.pipeline_mode<synchronous>, transform_indices = @transform_5, window_bounds = array<i64: 4, 128>}, {pipeline_mode = #tpu.pipeline_mode<synchronous>, transform_indices = @transform_6, window_bounds = array<i64: 1, 128>}, {pipeline_mode = #tpu.pipeline_mode<synchronous>, transform_indices = @transform_7, window_bounds = array<i64: 1, 128>}, {pipeline_mode = #tpu.pipeline_mode<synchronous>, transform_indices = @transform_8, window_bounds = array<i64: 1, 1>}, {transform_indices = @transform_9, window_bounds = array<i64: 8, 1>}]} {
    %c0 = arith.constant 0 : index
    %c0_0 = arith.constant 0 : index
    %0 = vector.load %arg1[%c0, %c0_0] : memref<8x32xf32, #tpu.memory_space<vmem>>, vector<8x32xf32>
    %c0_1 = arith.constant 0 : index
    %c0_2 = arith.constant 0 : index
    %1 = vector.load %arg3[%c0_1, %c0_2] : memref<32x256xf32, #tpu.memory_space<vmem>>, vector<32x256xf32>
    %cst = arith.constant dense<0.000000e+00> : vector<8x256xf32>
    %2 = tpu.matmul %0, %1, %cst {dimension_numbers = #tpu.dot_dimension_numbers<[1], [0], [0], [1], [0, 0, 1, 1], [], []>} : vector<8x32xf32>, vector<32x256xf32>, vector<8x256xf32> -> vector<8x256xf32>
    %c0_3 = arith.constant 0 : index
    %c0_4 = arith.constant 0 : index
    %3 = vector.load %arg4[%c0_3, %c0_4] : memref<1x256xf32, #tpu.memory_space<vmem>>, vector<1x256xf32>
    %4 = vector.broadcast %3 : vector<1x256xf32> to vector<8x256xf32>
    %5 = arith.addf %2, %4 : vector<8x256xf32>
    %cst_5 = arith.constant 0.000000e+00 : f32
    %6 = vector.broadcast %cst_5 : f32 to vector<8x256xf32>
    %7 = arith.maximumf %5, %6 : vector<8x256xf32>
    %8 = arith.truncf %7 : vector<8x256xf32> to vector<8x256xbf16>
    %c0_6 = arith.constant 0 : index
    %c0_7 = arith.constant 0 : index
    %9 = vector.load %arg5[%c0_6, %c0_7] : memref<256x128xf32, #tpu.memory_space<vmem>>, vector<256x128xf32>
    %10 = arith.truncf %9 : vector<256x128xf32> to vector<256x128xbf16>
    %cst_8 = arith.constant dense<0.000000e+00> : vector<8x128xf32>
    %11 = tpu.matmul %8, %10, %cst_8 {dimension_numbers = #tpu.dot_dimension_numbers<[1], [0], [0], [1], [0, 0, 1, 1], [], []>} : vector<8x256xbf16>, vector<256x128xbf16>, vector<8x128xf32> -> vector<8x128xf32>
    %c0_9 = arith.constant 0 : index
    %c0_10 = arith.constant 0 : index
    %12 = vector.load %arg7[%c0_9, %c0_10] : memref<1x128xf32, #tpu.memory_space<vmem>>, vector<1x128xf32>
    %13 = vector.broadcast %12 : vector<1x128xf32> to vector<8x128xf32>
    %14 = arith.addf %11, %13 : vector<8x128xf32>
    %c0_11 = arith.constant 0 : index
    %c0_12 = arith.constant 0 : index
    %15 = vector.load %arg2[%c0_11, %c0_12] : memref<8x4xf32, #tpu.memory_space<vmem>>, vector<8x4xf32>
    %c0_13 = arith.constant 0 : index
    %c0_14 = arith.constant 0 : index
    %16 = vector.load %arg6[%c0_13, %c0_14] : memref<4x128xf32, #tpu.memory_space<vmem>>, vector<4x128xf32>
    %17 = vector.extract_strided_slice %15 {offsets = [0, 0], sizes = [8, 1], strides = [1, 1]} : vector<8x4xf32> to vector<8x1xf32>
    %18 = vector.extract_strided_slice %16 {offsets = [0, 0], sizes = [1, 128], strides = [1, 1]} : vector<4x128xf32> to vector<1x128xf32>
    %19 = vector.broadcast %17 : vector<8x1xf32> to vector<8x128xf32>
    %20 = vector.broadcast %18 : vector<1x128xf32> to vector<8x128xf32>
    %21 = arith.mulf %19, %20 : vector<8x128xf32>
    %22 = vector.extract_strided_slice %15 {offsets = [0, 1], sizes = [8, 1], strides = [1, 1]} : vector<8x4xf32> to vector<8x1xf32>
    %23 = vector.extract_strided_slice %16 {offsets = [1, 0], sizes = [1, 128], strides = [1, 1]} : vector<4x128xf32> to vector<1x128xf32>
    %24 = vector.broadcast %22 : vector<8x1xf32> to vector<8x128xf32>
    %25 = vector.broadcast %23 : vector<1x128xf32> to vector<8x128xf32>
    %26 = arith.mulf %24, %25 : vector<8x128xf32>
    %27 = arith.addf %21, %26 : vector<8x128xf32>
    %28 = vector.extract_strided_slice %15 {offsets = [0, 2], sizes = [8, 1], strides = [1, 1]} : vector<8x4xf32> to vector<8x1xf32>
    %29 = vector.extract_strided_slice %16 {offsets = [2, 0], sizes = [1, 128], strides = [1, 1]} : vector<4x128xf32> to vector<1x128xf32>
    %30 = vector.broadcast %28 : vector<8x1xf32> to vector<8x128xf32>
    %31 = vector.broadcast %29 : vector<1x128xf32> to vector<8x128xf32>
    %32 = arith.mulf %30, %31 : vector<8x128xf32>
    %33 = arith.addf %27, %32 : vector<8x128xf32>
    %34 = vector.extract_strided_slice %15 {offsets = [0, 3], sizes = [8, 1], strides = [1, 1]} : vector<8x4xf32> to vector<8x1xf32>
    %35 = vector.extract_strided_slice %16 {offsets = [3, 0], sizes = [1, 128], strides = [1, 1]} : vector<4x128xf32> to vector<1x128xf32>
    %36 = vector.broadcast %34 : vector<8x1xf32> to vector<8x128xf32>
    %37 = vector.broadcast %35 : vector<1x128xf32> to vector<8x128xf32>
    %38 = arith.mulf %36, %37 : vector<8x128xf32>
    %39 = arith.addf %33, %38 : vector<8x128xf32>
    %40 = arith.addf %14, %39 : vector<8x128xf32>
    %cst_15 = arith.constant 0.000000e+00 : f32
    %41 = vector.broadcast %cst_15 : f32 to vector<8x128xf32>
    %42 = arith.maximumf %40, %41 : vector<8x128xf32>
    %c0_16 = arith.constant 0 : index
    %c0_17 = arith.constant 0 : index
    %43 = vector.load %arg8[%c0_16, %c0_17] : memref<1x128xf32, #tpu.memory_space<vmem>>, vector<1x128xf32>
    %44 = vector.broadcast %43 : vector<1x128xf32> to vector<8x128xf32>
    %45 = arith.mulf %42, %44 : vector<8x128xf32>
    %cst_18 = arith.constant dense<0.000000e+00> : vector<8xf32>
    %46 = vector.multi_reduction <add>, %45, %cst_18 [1] : vector<8x128xf32> to vector<8xf32>
    %47 = vector.shape_cast %46 : vector<8xf32> to vector<8x1xf32>
    %c0_19 = arith.constant 0 : index
    %c0_20 = arith.constant 0 : index
    %48 = vector.load %arg9[%c0_19, %c0_20] : memref<1x1xf32, #tpu.memory_space<vmem>>, vector<1x1xf32>
    %49 = vector.broadcast %48 : vector<1x1xf32> to vector<8x1xf32>
    %50 = arith.addf %47, %49 : vector<8x1xf32>
    %c0_21 = arith.constant 0 : index
    %c0_22 = arith.constant 0 : index
    %51 = vector.load %arg10[%c0_21, %c0_22] : memref<8x1xf32, #tpu.memory_space<vmem>>, vector<8x1xf32>
    tpu.vector_store %arg10[%c0_21, %c0_22], %50 {strides = array<i32>} : memref<8x1xf32, #tpu.memory_space<vmem>>, vector<8x1xf32>,
    return
  }
  func.func @transform_0(%arg0: i32) -> (i32, i32) {
    %c0_i32 = arith.constant 0 : i32
    %c0_i32_0 = arith.constant 0 : i32
    return %arg0, %c0_i32 : i32, i32
  }
  func.func @transform_1(%arg0: i32) -> (i32, i32) {
    %c0_i32 = arith.constant 0 : i32
    %c0_i32_0 = arith.constant 0 : i32
    return %arg0, %c0_i32 : i32, i32
  }
  func.func @transform_2(%arg0: i32) -> (i32, i32) {
    %c0_i32 = arith.constant 0 : i32
    %c0_i32_0 = arith.constant 0 : i32
    %c0_i32_1 = arith.constant 0 : i32
    return %c0_i32, %c0_i32_0 : i32, i32
  }
  func.func @transform_3(%arg0: i32) -> (i32, i32) {
    %c0_i32 = arith.constant 0 : i32
    %c0_i32_0 = arith.constant 0 : i32
    %c0_i32_1 = arith.constant 0 : i32
    return %c0_i32, %c0_i32_0 : i32, i32
  }
  func.func @transform_4(%arg0: i32) -> (i32, i32) {
    %c0_i32 = arith.constant 0 : i32
    %c0_i32_0 = arith.constant 0 : i32
    %c0_i32_1 = arith.constant 0 : i32
    return %c0_i32, %c0_i32_0 : i32, i32
  }
  func.func @transform_5(%arg0: i32) -> (i32, i32) {
    %c0_i32 = arith.constant 0 : i32
    %c0_i32_0 = arith.constant 0 : i32
    %c0_i32_1 = arith.constant 0 : i32
    return %c0_i32, %c0_i32_0 : i32, i32
  }
  func.func @transform_6(%arg0: i32) -> (i32, i32) {
    %c0_i32 = arith.constant 0 : i32
    %c0_i32_0 = arith.constant 0 : i32
    %c0_i32_1 = arith.constant 0 : i32
    return %c0_i32, %c0_i32_0 : i32, i32
  }
  func.func @transform_7(%arg0: i32) -> (i32, i32) {
    %c0_i32 = arith.constant 0 : i32
    %c0_i32_0 = arith.constant 0 : i32
    %c0_i32_1 = arith.constant 0 : i32
    return %c0_i32, %c0_i32_0 : i32, i32
  }
  func.func @transform_8(%arg0: i32) -> (i32, i32) {
    %c0_i32 = arith.constant 0 : i32
    %c0_i32_0 = arith.constant 0 : i32
    %c0_i32_1 = arith.constant 0 : i32
    return %c0_i32, %c0_i32_0 : i32, i32
  }
  func.func @transform_9(%arg0: i32) -> (i32, i32) {
    %c0_i32 = arith.constant 0 : i32
    %c0_i32_0 = arith.constant 0 : i32
    return %arg0, %c0_i32 : i32, i32
  }
}

module attributes {stable_mosaic.version = 11 : i64} {
  func.func @_critic_kernel(%arg0: i32, %arg1: memref<8x32xf32, #tpu.memory_space<vmem>>, %arg2: memref<8x4xf32, #tpu.memory_space<vmem>>, %arg3: memref<32x256xf32, #tpu.memory_space<vmem>>, %arg4: memref<1x256xf32, #tpu.memory_space<vmem>>, %arg5: memref<256x128xf32, #tpu.memory_space<vmem>>, %arg6: memref<4x128xf32, #tpu.memory_space<vmem>>, %arg7: memref<1x128xf32, #tpu.memory_space<vmem>>, %arg8: memref<1x128xf32, #tpu.memory_space<vmem>>, %arg9: memref<1x1xf32, #tpu.memory_space<vmem>>, %arg10: memref<8x1xf32, #tpu.memory_space<vmem>>) attributes {dimension_semantics = [#tpu.dimension_semantics<parallel>], iteration_bounds = array<i64: 1>, scalar_prefetch = 0 : i64, scratch_operands = 0 : i64, tpu.core_type = #tpu.core_type<tc>, window_params = [{transform_indices = @transform_0, window_bounds = array<i64: 8, 32>}, {transform_indices = @transform_1, window_bounds = array<i64: 8, 4>}, {pipeline_mode = #tpu.pipeline_mode<synchronous>, transform_indices = @transform_2, window_bounds = array<i64: 32, 256>}, {pipeline_mode = #tpu.pipeline_mode<synchronous>, transform_indices = @transform_3, window_bounds = array<i64: 1, 256>}, {pipeline_mode = #tpu.pipeline_mode<synchronous>, transform_indices = @transform_4, window_bounds = array<i64: 256, 128>}, {pipeline_mode = #tpu.pipeline_mode<synchronous>, transform_indices = @transform_5, window_bounds = array<i64: 4, 128>}, {pipeline_mode = #tpu.pipeline_mode<synchronous>, transform_indices = @transform_6, window_bounds = array<i64: 1, 128>}, {pipeline_mode = #tpu.pipeline_mode<synchronous>, transform_indices = @transform_7, window_bounds = array<i64: 1, 128>}, {pipeline_mode = #tpu.pipeline_mode<synchronous>, transform_indices = @transform_8, window_bounds = array<i64: 1, 1>}, {transform_indices = @transform_9, window_bounds = array<i64: 8, 1>}]} {
    %c0 = arith.constant 0 : index
    %c0_0 = arith.constant 0 : index
    %0 = vector.load %arg1[%c0, %c0_0] : memref<8x32xf32, #tpu.memory_space<vmem>>, vector<8x32xf32>
    %c0_1 = arith.constant 0 : index
    %c0_2 = arith.constant 0 : index
    %1 = vector.load %arg3[%c0_1, %c0_2] : memref<32x256xf32, #tpu.memory_space<vmem>>, vector<32x256xf32>
    %cst = arith.constant dense<0.000000e+00> : vector<8x256xf32>
    %2 = tpu.matmul %0, %1, %cst {dimension_numbers = #tpu.dot_dimension_numbers<[1], [0], [0], [1], [0, 0, 1, 1], [], []>} : vector<8x32xf32>, vector<32x256xf32>, vector<8x256xf32> -> vector<8x256xf32>
    %c0_3 = arith.constant 0 : index
    %c0_4 = arith.constant 0 : index
    %3 = vector.load %arg4[%c0_3, %c0_4] : memref<1x256xf32, #tpu.memory_space<vmem>>, vector<1x256xf32>
    %4 = vector.broadcast %3 : vector<1x256xf32> to vector<8x256xf32>
    %5 = arith.addf %2, %4 : vector<8x256xf32>
    %cst_5 = arith.constant 0.000000e+00 : f32
    %6 = vector.broadcast %cst_5 : f32 to vector<8x256xf32>
    %7 = arith.maximumf %5, %6 : vector<8x256xf32>
    %8 = arith.truncf %7 : vector<8x256xf32> to vector<8x256xbf16>
    %c0_6 = arith.constant 0 : index
    %c0_7 = arith.constant 0 : index
    %9 = vector.load %arg5[%c0_6, %c0_7] : memref<256x128xf32, #tpu.memory_space<vmem>>, vector<256x128xf32>
    %10 = arith.truncf %9 : vector<256x128xf32> to vector<256x128xbf16>
    %cst_8 = arith.constant dense<0.000000e+00> : vector<8x128xf32>
    %11 = tpu.matmul %8, %10, %cst_8 {dimension_numbers = #tpu.dot_dimension_numbers<[1], [0], [0], [1], [0, 0, 1, 1], [], []>} : vector<8x256xbf16>, vector<256x128xbf16>, vector<8x128xf32> -> vector<8x128xf32>
    %c0_9 = arith.constant 0 : index
    %c0_10 = arith.constant 0 : index
    %12 = vector.load %arg7[%c0_9, %c0_10] : memref<1x128xf32, #tpu.memory_space<vmem>>, vector<1x128xf32>
    %13 = vector.broadcast %12 : vector<1x128xf32> to vector<8x128xf32>
    %14 = arith.addf %11, %13 : vector<8x128xf32>
    %c0_11 = arith.constant 0 : index
    %c0_12 = arith.constant 0 : index
    %15 = vector.load %arg2[%c0_11, %c0_12] : memref<8x4xf32, #tpu.memory_space<vmem>>, vector<8x4xf32>
    %c0_13 = arith.constant 0 : index
    %c0_14 = arith.constant 0 : index
    %16 = vector.load %arg6[%c0_13, %c0_14] : memref<4x128xf32, #tpu.memory_space<vmem>>, vector<4x128xf32>
    %17 = vector.extract_strided_slice %15 {offsets = [0, 0], sizes = [8, 1], strides = [1, 1]} : vector<8x4xf32> to vector<8x1xf32>
    %18 = vector.extract_strided_slice %16 {offsets = [0, 0], sizes = [1, 128], strides = [1, 1]} : vector<4x128xf32> to vector<1x128xf32>
    %19 = vector.broadcast %17 : vector<8x1xf32> to vector<8x128xf32>
    %20 = vector.broadcast %18 : vector<1x128xf32> to vector<8x128xf32>
    %21 = arith.mulf %19, %20 : vector<8x128xf32>
    %22 = vector.extract_strided_slice %15 {offsets = [0, 1], sizes = [8, 1], strides = [1, 1]} : vector<8x4xf32> to vector<8x1xf32>
    %23 = vector.extract_strided_slice %16 {offsets = [1, 0], sizes = [1, 128], strides = [1, 1]} : vector<4x128xf32> to vector<1x128xf32>
    %24 = vector.broadcast %22 : vector<8x1xf32> to vector<8x128xf32>
    %25 = vector.broadcast %23 : vector<1x128xf32> to vector<8x128xf32>
    %26 = arith.mulf %24, %25 : vector<8x128xf32>
    %27 = arith.addf %21, %26 : vector<8x128xf32>
    %28 = vector.extract_strided_slice %15 {offsets = [0, 2], sizes = [8, 1], strides = [1, 1]} : vector<8x4xf32> to vector<8x1xf32>
    %29 = vector.extract_strided_slice %16 {offsets = [2, 0], sizes = [1, 128], strides = [1, 1]} : vector<4x128xf32> to vector<1x128xf32>
    %30 = vector.broadcast %28 : vector<8x1xf32> to vector<8x128xf32>
    %31 = vector.broadcast %29 : vector<1x128xf32> to vector<8x128xf32>
    %32 = arith.mulf %30, %31 : vector<8x128xf32>
    %33 = arith.addf %27, %32 : vector<8x128xf32>
    %34 = vector.extract_strided_slice %15 {offsets = [0, 3], sizes = [8, 1], strides = [1, 1]} : vector<8x4xf32> to vector<8x1xf32>
    %35 = vector.extract_strided_slice %16 {offsets = [3, 0], sizes = [1, 128], strides = [1, 1]} : vector<4x128xf32> to vector<1x128xf32>
    %36 = vector.broadcast %34 : vector<8x1xf32> to vector<8x128xf32>
    %37 = vector.broadcast %35 : vector<1x128xf32> to vector<8x128xf32>
    %38 = arith.mulf %36, %37 : vector<8x128xf32>
    %39 = arith.addf %33, %38 : vector<8x128xf32>
    %40 = arith.addf %14, %39 : vector<8x128xf32>
    %cst_15 = arith.constant 0.000000e+00 : f32
    %41 = vector.broadcast %cst_15 : f32 to vector<8x128xf32>
    %42 = arith.maximumf %40, %41 : vector<8x128xf32>
    %c0_16 = arith.constant 0 : index
    %c0_17 = arith.constant 0 : index
    %43 = vector.load %arg8[%c0_16, %c0_17] : memref<1x128xf32, #tpu.memory_space<vmem>>, vector<1x128xf32>
    %44 = vector.broadcast %43 : vector<1x128xf32> to vector<8x128xf32>
    %45 = arith.mulf %42, %44 : vector<8x128xf32>
    %cst_18 = arith.constant dense<0.000000e+00> : vector<8xf32>
    %46 = vector.multi_reduction <add>, %45, %cst_18 [1] : vector<8x128xf32> to vector<8xf32>
    %47 = vector.shape_cast %46 : vector<8xf32> to vector<8x1xf32>
    %c0_19 = arith.constant 0 : index
    %c0_20 = arith.constant 0 : index
    %48 = vector.load %arg9[%c0_19, %c0_20] : memref<1x1xf32, #tpu.memory_space<vmem>>, vector<1x1xf32>
    %49 = vector.broadcast %48 : vector<1x1xf32> to vector<8x1xf32>
    %50 = arith.addf %47, %49 : vector<8x1xf32>
    %c0_21 = arith.constant 0 : index
    %c0_22 = arith.constant 0 : index
    %51 = vector.load %arg10[%c0_21, %c0_22] : memref<8x1xf32, #tpu.memory_space<vmem>>, vector<8x1xf32>
    tpu.vector_store %arg10[%c0_21, %c0_22], %50 {strides = array<i32>} : memref<8x1xf32, #tpu.memory_space<vmem>>, vector<8x1xf32>,
    return
  }
  func.func @transform_0(%arg0: i32) -> (i32, i32) {
    %c0_i32 = arith.constant 0 : i32
    %c0_i32_0 = arith.constant 0 : i32
    return %arg0, %c0_i32 : i32, i32
  }
  func.func @transform_1(%arg0: i32) -> (i32, i32) {
    %c0_i32 = arith.constant 0 : i32
    %c0_i32_0 = arith.constant 0 : i32
    return %arg0, %c0_i32 : i32, i32
  }
  func.func @transform_2(%arg0: i32) -> (i32, i32) {
    %c0_i32 = arith.constant 0 : i32
    %c0_i32_0 = arith.constant 0 : i32
    %c0_i32_1 = arith.constant 0 : i32
    return %c0_i32, %c0_i32_0 : i32, i32
  }
  func.func @transform_3(%arg0: i32) -> (i32, i32) {
    %c0_i32 = arith.constant 0 : i32
    %c0_i32_0 = arith.constant 0 : i32
    %c0_i32_1 = arith.constant 0 : i32
    return %c0_i32, %c0_i32_0 : i32, i32
  }
  func.func @transform_4(%arg0: i32) -> (i32, i32) {
    %c0_i32 = arith.constant 0 : i32
    %c0_i32_0 = arith.constant 0 : i32
    %c0_i32_1 = arith.constant 0 : i32
    return %c0_i32, %c0_i32_0 : i32, i32
  }
  func.func @transform_5(%arg0: i32) -> (i32, i32) {
    %c0_i32 = arith.constant 0 : i32
    %c0_i32_0 = arith.constant 0 : i32
    %c0_i32_1 = arith.constant 0 : i32
    return %c0_i32, %c0_i32_0 : i32, i32
  }
  func.func @transform_6(%arg0: i32) -> (i32, i32) {
    %c0_i32 = arith.constant 0 : i32
    %c0_i32_0 = arith.constant 0 : i32
    %c0_i32_1 = arith.constant 0 : i32
    return %c0_i32, %c0_i32_0 : i32, i32
  }
  func.func @transform_7(%arg0: i32) -> (i32, i32) {
    %c0_i32 = arith.constant 0 : i32
    %c0_i32_0 = arith.constant 0 : i32
    %c0_i32_1 = arith.constant 0 : i32
    return %c0_i32, %c0_i32_0 : i32, i32
  }
  func.func @transform_8(%arg0: i32) -> (i32, i32) {
    %c0_i32 = arith.constant 0 : i32
    %c0_i32_0 = arith.constant 0 : i32
    %c0_i32_1 = arith.constant 0 : i32
    return %c0_i32, %c0_i32_0 : i32, i32
  }
  func.func @transform_9(%arg0: i32) -> (i32, i32) {
    %c0_i32 = arith.constant 0 : i32
    %c0_i32_0 = arith.constant 0 : i32
    return %arg0, %c0_i32 : i32, i32
  }
}

</mosaic_0001>

<bundles_post_ra>
// kernel: tpu_custom_call.1
= control target key start
LH: loop header
LB: loop body
LE: loop exit
PB: predicated region body
PF: predicated region fallthrough
CT: control target
= control target key end

     0   :  { %s505_s0 = inlined_call_operand.vmem [shape: f32[8,32], index: 0, kind: input, shape index: {}]   ;;  %s506_s1 = inlined_call_operand.vmem [shape: f32[8,4], index: 1, kind: input, shape index: {}]   ;;  %s507_s2 = inlined_call_operand.hbm [shape: f32[32,256], index: 2, kind: input, shape index: {}]   ;;  %s508_s3 = inlined_call_operand.vmem [shape: f32[1,256], index: 3, kind: input, shape index: {}]   ;;  %s509_s4 = inlined_call_operand.hbm [shape: f32[256,128], index: 4, kind: input, shape index: {}]   ;;  %s510_s5 = inlined_call_operand.vmem [shape: f32[4,128], index: 5, kind: input, shape index: {}]   ;;  %s511_s6 = inlined_call_operand.vmem [shape: f32[1,128], index: 6, kind: input, shape index: {}]   ;;  %s512_s7 = inlined_call_operand.vmem [shape: f32[1,128], index: 7, kind: input, shape index: {}]   ;;  %s513_s8 = inlined_call_operand.<no memory space> [shape: f32[1,1], index: 8, kind: input, shape index: {}]   ;;  %s514_s9 = inlined_call_operand.vmem [shape: f32[8,1], index: 9, kind: output, shape index: {}]  }
   0x1   :  { %v14_v0 = vstv %s513_s8 }
   0x2   :  { %15 = vst [vmem:[#allocation2] sm:$0x1] %v14_v0 }
   0x3   :  { %16 = vsyncpa [#allocation4], 0 }
   0x4   :  { %17 = vsyncpa [#allocation6], 0  ;;  %s414_s11 = smov [#allocation3]  }
   0x5   :  { %s27_s12 = sshll.u32 %s414_s11, 4  ;;  %s28_s12 = int_to_ptr.vmem [resolvable:$true] %s27_s12 }
   0x6   :  { %s378_s13 = scalar_lea.vmem %s28_s12, 1024  ;;  %p383_p1 = scmp.lt.s32.totalorder %s28_s12, %s28_s12 }
   0x7   :  { %p379_p0 = scmp.ne.s32.totalorder %s28_s12, %s378_s13  ;;  %p384_p2 = scmp.lt.s32.totalorder %s378_s13, %s378_s13 }
   0x9   :  { %p385_p3 = por %p384_p2, %p383_p1 }
   0xb   :  { %p386_p4 = pnand %p385_p3, %p379_p0 }
   0xd   :  { %389 = shalt.err (!%p386_p4)
}
   0xe   :  { %s415_s14 = smov 256   ;;  %s416_s15 = smov 16  }
   0xf   :  { %33 = dma.hbm_to_vmem [thread:$0]  %s507_s2, 1024, %s28_s12, [#allocation4], %s415_s14, %s415_s14, %s416_s15  }
  0x10   :  { %s417_s8 = smov [#allocation5]  }
  0x11   :  { %s41_s18 = sshll.u32 %s417_s8, 4  ;;  %s42_s18 = int_to_ptr.vmem [resolvable:$true] %s41_s18 }
  0x12   :  { %s398_s19 = scalar_lea.vmem %s42_s18, 4096  ;;  %p403_p6 = scmp.lt.s32.totalorder %s42_s18, %s42_s18 }
  0x13   :  { %p399_p5 = scmp.ne.s32.totalorder %s42_s18, %s398_s19  ;;  %p404_p7 = scmp.lt.s32.totalorder %s398_s19, %s398_s19 }
  0x15   :  { %p405_p8 = por %p404_p7, %p403_p6 }
  0x17   :  { %p406_p9 = pnand %p405_p8, %p399_p5 }
  0x19   :  { %409 = shalt.err (!%p406_p9)
}
  0x1a   :  { %s418_s20 = smov 128   ;;  %s419_s21 = smov 8  }
  0x1b   :  { %47 = dma.hbm_to_vmem [thread:$0]  %s509_s4, 4096, %s42_s18, [#allocation6], %s418_s20, %s418_s20, %s419_s21  }
  0x1c   :  { %410 = dma.done.wait [#allocation4], 1024  }
  0x1d   :  { %411 = vsyncadd [#allocation4], 4294966272 }
  0x1e   :  { %412 = dma.done.wait [#allocation6], 4096  }
  0x1f   :  { %413 = vsyncadd [#allocation6], 4294963200  ;;  %v420_v1 = vmov 0.0   ;;  %v71_v2 = vld [vmem:[#allocation3 + $0x38] sm:$0xff]  ;;  %v70_v3 = vld [vmem:[#allocation3 + $0x30] sm:$0xff]  ;;  %vm84_vm0 = vcmask 261120   ;;  %v74_v0 = vlaneseq }
  0x20   :  { %152 = vmatprep.mubr.f32.mxu0 %v420_v1  ;;  %v69_v4 = vld [vmem:[#allocation3 + $0x28] sm:$0xff]  ;;  %112 = vmatprep.subr.mxu0 %v71_v2  ;;  %v68_v5 = vld [vmem:[#allocation3 + $0x20] sm:$0xff]  ;;  %v67_v6 = vld [vmem:[#allocation3 + $0x18] sm:$0xff]  ;;  %v421_v60 = vmov 0   ;;  %v422_v61 = vmov 2   ;;  %v423_v62 = vmov 1  }
  0x21   :  { %113 = vmatpush1.msra.mxu0 %v70_v3  ;;  %v66_v7 = vld [vmem:[#allocation3 + $0x10] sm:$0xff]  ;;  %v65_v8 = vld [vmem:[#allocation3 + $0x8] sm:$0xff]  ;;  %v64_v9 = vld [vmem:[#allocation3] sm:$0xff]  ;;  %365 = vset.pattern.permute.xlu0 %v421_v60  ;;  %v424_v63 = vmov 3   ;;  %v75_v1 = vshrl.u32 %v74_v0, 7  ;;  %vm320_vm1 = vcmask 7168  }
  0x22   :  { %114 = vmatprep.subr.mxu0 %v69_v4  ;;  %v193_v10 = vld [vmem:[#allocation5 + $0xf0] sm:$0xff]  ;;  %v194_v11 = vld [vmem:[#allocation5 + $0xf8] sm:$0xff]  ;;  %v191_v15 = vld [vmem:[#allocation5 + $0xe0] sm:$0xff]  ;;  %367 = vset.pattern.permute.xlu1 %v422_v61 }
  0x23   :  { %v177_v12 = vld [vmem:[#allocation5 + $0x70] sm:$0xff]  ;;  %115 = vmatpush1.msra.mxu0 %v68_v5  ;;  %v210_v13 = vpack.c.bf16 %v194_v11, %v193_v10  ;;  %v178_v14 = vld [vmem:[#allocation5 + $0x78] sm:$0xff]  ;;  %v192_v16 = vld [vmem:[#allocation5 + $0xe8] sm:$0xff]  ;;  %v76_v2 = vsub.s32 0, %v75_v1  ;;  %v80_v4 = vsub.s32 1, %v75_v1 }
  0x24   :  { %116 = vmatprep.subr.mxu0 %v67_v6  ;;  %v202_v17 = vpack.c.bf16 %v178_v14, %v177_v12  ;;  %v209_v18 = vpack.c.bf16 %v192_v16, %v191_v15  ;;  %v175_v19 = vld [vmem:[#allocation5 + $0x60] sm:$0xff]  ;;  %v176_v20 = vld [vmem:[#allocation5 + $0x68] sm:$0xff]  ;;  %v189_v21 = vld [vmem:[#allocation5 + $0xd0] sm:$0xff] }
  0x25   :  { %117 = vmatpush1.msra.mxu0 %v66_v7  ;;  %v63_v22 = vld [vmem:[%s505_s0] sm:$0xff]  ;;  %332 = vmatprep.subr.bf16.mxu1 %v210_v13  ;;  %v201_v24 = vpack.c.bf16 %v176_v20, %v175_v19  ;;  %v173_v26 = vld [vmem:[#allocation5 + $0x50] sm:$0xff]  ;;  %v188_v29 = vld [vmem:[#allocation5 + $0xc8] sm:$0xff] }
  0x26   :  { %v190_v23 = vld [vmem:[#allocation5 + $0xd8] sm:$0xff]  ;;  %118 = vmatprep.subr.mxu0 %v65_v8  ;;  %333 = vmatpush3.bf16.msra.mxu1 %v202_v17  ;;  %v187_v28 = vld [vmem:[#allocation5 + $0xc0] sm:$0xff]  ;;  %v172_v33 = vld [vmem:[#allocation5 + $0x48] sm:$0xff] }
  0x27   :  { %119 = vmatpush1.msra.mxu0 %v64_v9  ;;  %334 = vmatprep.subr.bf16.mxu1 %v209_v18  ;;  %v208_v25 = vpack.c.bf16 %v190_v23, %v189_v21  ;;  %v174_v27 = vld [vmem:[#allocation5 + $0x58] sm:$0xff]  ;;  %v207_v31 = vpack.c.bf16 %v188_v29, %v187_v28  ;;  %v171_v32 = vld [vmem:[#allocation5 + $0x40] sm:$0xff]  ;;  %v185_v34 = vld [vmem:[#allocation5 + $0xb0] sm:$0xff]  ;;  %v286_v18 = vsub.s32 2, %v75_v1 }
  0x28   :  { %328 = vmatmul.mubr.msk.f32.vlgmr.msra.gmra.mxu0 %vm84_vm0, %v63_v22  ;;  %v200_v30 = vpack.c.bf16 %v174_v27, %v173_v26  ;;  %v186_v35 = vld [vmem:[#allocation5 + $0xb8] sm:$0xff]  ;;  %v199_v36 = vpack.c.bf16 %v172_v33, %v171_v32  ;;  %v169_v38 = vld [vmem:[#allocation5 + $0x30] sm:$0xff]  ;;  %v183_v40 = vld [vmem:[#allocation5 + $0xa0] sm:$0xff] }
  0x29   :  { %v206_v37 = vpack.c.bf16 %v186_v35, %v185_v34  ;;  %v170_v39 = vld [vmem:[#allocation5 + $0x38] sm:$0xff]  ;;  %v184_v41 = vld [vmem:[#allocation5 + $0xa8] sm:$0xff]  ;;  %v167_v44 = vld [vmem:[#allocation5 + $0x20] sm:$0xff] }
  0x2a   :  { %335 = vmatpush3.bf16.msra.mxu1 %v201_v24  ;;  %v198_v42 = vpack.c.bf16 %v170_v39, %v169_v38  ;;  %v205_v43 = vpack.c.bf16 %v184_v41, %v183_v40  ;;  %v168_v45 = vld [vmem:[#allocation5 + $0x28] sm:$0xff]  ;;  %v181_v47 = vld [vmem:[#allocation5 + $0x90] sm:$0xff]  ;;  %v182_v48 = vld [vmem:[#allocation5 + $0x98] sm:$0xff] }
  0x2b   :  { %336 = vmatprep.subr.bf16.mxu1 %v208_v25  ;;  %v197_v46 = vpack.c.bf16 %v168_v45, %v167_v44  ;;  %v204_v49 = vpack.c.bf16 %v182_v48, %v181_v47  ;;  %v165_v50 = vld [vmem:[#allocation5 + $0x10] sm:$0xff]  ;;  %v166_v51 = vld [vmem:[#allocation5 + $0x18] sm:$0xff]  ;;  %v179_v53 = vld [vmem:[#allocation5 + $0x80] sm:$0xff]  ;;  %v296_v25 = vsub.s32 3, %v75_v1 }
  0x2c   :  { %v196_v52 = vpack.c.bf16 %v166_v51, %v165_v50  ;;  %v180_v54 = vld [vmem:[#allocation5 + $0x88] sm:$0xff]  ;;  %v163_v56 = vld [vmem:[#allocation5] sm:$0xff]  ;;  %v329_v33 = vld [vmem:[%s511_s6] ss:$0 sm:$0xff] }
  0x2d   :  { %v203_v55 = vpack.c.bf16 %v180_v54, %v179_v53  ;;  %v164_v57 = vld [vmem:[#allocation5 + $0x8] sm:$0xff]  ;;  %v258_v59 = vld [vmem:[%s506_s1] sm:$0xff] }
  0x2e   :  { %337 = vmatpush3.bf16.msra.mxu1 %v200_v30  ;;  %v195_v58 = vpack.c.bf16 %v164_v57, %v163_v56  ;;  %262 = vperm.xlu0 %365, %v258_v59   ;;  %v72_v3 = vld [vmem:[%s508_s3] sm:$0x3] }
  0x2f   :  { %338 = vmatprep.subr.bf16.mxu1 %v207_v31  ;;  %281 = vperm.xlu1 %367, %v258_v59   ;;  %v77_v5 = vrot.slane %v72_v3, %v76_v2  ;;  %v81_v6 = vrot.slane %v72_v3, %v80_v4  ;;  %v259_v16 = vld [vmem:[%s510_s5] sm:$0xf] }
  0x30   :  { %v268_v17 = vrot.slane %v259_v16, %v76_v2  ;;  %v277_v19 = vrot.slane %v259_v16, %v80_v4  ;;  %v287_v23 = vrot.slane %v259_v16, %v286_v18  ;;  %v297_v28 = vrot.slane %v259_v16, %v296_v25  ;;  %v330_v41 = vld [vmem:[%s512_s7] ss:$0 sm:$0xff] }
  0x31   :  { %v331_v44 = vld [vmem:[#allocation2] ss:$0 sm:$0xff] }
  0x32   :  { %339 = vmatpush3.bf16.msra.mxu1 %v199_v36  ;;  %366 = vset.pattern.permute.xlu0 %v423_v62 }
  0x33   :  { %340 = vmatprep.subr.bf16.mxu1 %v206_v37  ;;  %368 = vset.pattern.permute.xlu1 %v424_v63 }
  0x34   :  { %271 = vperm.xlu0 %366, %v258_v59   ;;  %291 = vperm.xlu1 %368, %v258_v59  }
  0x36   :  { %341 = vmatpush3.bf16.msra.mxu1 %v198_v42 }
  0x37   :  { %342 = vmatprep.subr.bf16.mxu1 %v205_v43 }
  0x38   :  { %369 = vset.pattern.permute.xlu0 %v424_v63 }
  0x3a   :  { %343 = vmatpush3.bf16.msra.mxu1 %v197_v46 }
  0x3b   :  { %344 = vmatprep.subr.bf16.mxu1 %v204_v49 }
  0x3e   :  { %345 = vmatpush3.bf16.msra.mxu1 %v196_v52 }
  0x3f   :  { %346 = vmatprep.subr.bf16.mxu1 %v203_v55 }
  0x42   :  { %347 = vmatpush3.bf16.msra.mxu1 %v195_v58 }
  0xa9   :  { %v263_v15 = vpop.permute.xlu0 %262 }
  0xaa   :  { %v282_v21 = vpop.permute.xlu1 %281  ;;  %v269_v22 = vmul.f32 %v268_v17, %v263_v15 }
  0xab   :  { %v288_v26 = vmul.f32 %v287_v23, %v282_v21 }
  0xaf   :  { %v272_v20 = vpop.permute.xlu0 %271  ;;  %v292_v29 = vpop.permute.xlu1 %291 }
  0xb0   :  { %v278_v24 = vmul.f32 %v277_v19, %v272_v20  ;;  %v298_v32 = vmul.f32 %v297_v28, %v292_v29 }
  0xb2   :  { %v279_v27 = vadd.f32 %v278_v24, %v269_v22 }
  0xb4   :  { %v289_v31 = vadd.f32 %v288_v26, %v279_v27 }
  0xb6   :  { %v299_v37 = vadd.f32 %v298_v32, %v289_v31 }
  0xe8   :  { %v154_v7 = vpop.f32.mrf.mxu0 }
  0xe9   :  { %v155_v8 = vadd.f32 %v154_v7, %v77_v5 }
  0xea   :  { %v156_v9 = vpop.f32.mrf.mxu0 }
  0xeb   :  { %v157_v10 = vadd.f32 %v156_v9, %v81_v6  ;;  %v159_v11 = vmax.f32 %v155_v8, 0.0 }
  0xed   :  { %v160_v12 = vmax.f32 %v157_v10, 0.0  ;;  %v161_v14 = vpack.c.bf16 %v159_v11, %v159_v11 }
  0xef   :  { %v162_v13 = vpack.c.bf16 %v160_v12, %v160_v12 }
  0xf1   :  { %250 = vmatprep.mubr.bf16.mxu1 %v162_v13 }
  0xf2   :  { %251 = vmatmul.mubr.bf16.vlgmr.msra.gmra.mxu1 %v161_v14 }
 0x1b2   :  { %v348_v30 = vpop.f32.mrf.mxu1 }
 0x1b4   :  { %v349_v34 = vpop.f32.mrf.mxu1 }
 0x1b5   :  { %v350_v35 = vadd.f32 %v349_v34, %v348_v30 }
 0x1b6   :  { %v351_v36 = vpop.f32.mrf.mxu1 }
 0x1b7   :  { %v253_v38 = vadd.f32 %v350_v35, %v329_v33 }
 0x1b8   :  { %v352_v39 = vpop.f32.mrf.mxu1 }
 0x1b9   :  { %v300_v40 = vadd.f32 %v299_v37, %v253_v38 }
 0x1bb   :  { %v301_v42 = vmax.f32 %v300_v40, 0.0 }
 0x1bd   :  { %v309_v43 = vmul.f32 %v330_v41, %v301_v42 }
 0x1bf   :  { %310 = vadd.xlane.f32.xlu1 %v309_v43 }
 0x248   :  { %v311_v45 = vpop.xlane.xlu1 %310 }
 0x249   :  { %v319_v46 = vadd.f32 %v331_v44, %v311_v45 }
 0x24b   :  { %321 = vst.msk [vmem:[%s514_s9] sm:$0xff] %vm320_vm1, %v319_v46 }
 0x24c   :  { %326 = vsyncpa [#allocation4], 1 }
 0x24d   :  { %327 = vsyncpa [#allocation6], 1 }

// kernel: tpu_custom_call.1
= control target key start
LH: loop header
LB: loop body
LE: loop exit
PB: predicated region body
PF: predicated region fallthrough
CT: control target
= control target key end

     0   :  { %s505_s0 = inlined_call_operand.vmem [shape: f32[8,32], index: 0, kind: input, shape index: {}]   ;;  %s506_s1 = inlined_call_operand.vmem [shape: f32[8,4], index: 1, kind: input, shape index: {}]   ;;  %s507_s2 = inlined_call_operand.hbm [shape: f32[32,256], index: 2, kind: input, shape index: {}]   ;;  %s508_s3 = inlined_call_operand.vmem [shape: f32[1,256], index: 3, kind: input, shape index: {}]   ;;  %s509_s4 = inlined_call_operand.hbm [shape: f32[256,128], index: 4, kind: input, shape index: {}]   ;;  %s510_s5 = inlined_call_operand.vmem [shape: f32[4,128], index: 5, kind: input, shape index: {}]   ;;  %s511_s6 = inlined_call_operand.vmem [shape: f32[1,128], index: 6, kind: input, shape index: {}]   ;;  %s512_s7 = inlined_call_operand.vmem [shape: f32[1,128], index: 7, kind: input, shape index: {}]   ;;  %s513_s8 = inlined_call_operand.<no memory space> [shape: f32[1,1], index: 8, kind: input, shape index: {}]   ;;  %s514_s9 = inlined_call_operand.vmem [shape: f32[8,1], index: 9, kind: output, shape index: {}]  }
   0x1   :  { %v14_v0 = vstv %s513_s8 }
   0x2   :  { %15 = vst [vmem:[#allocation2] sm:$0x1] %v14_v0 }
   0x3   :  { %16 = vsyncpa [#allocation4], 0 }
   0x4   :  { %17 = vsyncpa [#allocation6], 0  ;;  %s414_s11 = smov [#allocation3]  }
   0x5   :  { %s27_s12 = sshll.u32 %s414_s11, 4  ;;  %s28_s12 = int_to_ptr.vmem [resolvable:$true] %s27_s12 }
   0x6   :  { %s378_s13 = scalar_lea.vmem %s28_s12, 1024  ;;  %p383_p1 = scmp.lt.s32.totalorder %s28_s12, %s28_s12 }
   0x7   :  { %p379_p0 = scmp.ne.s32.totalorder %s28_s12, %s378_s13  ;;  %p384_p2 = scmp.lt.s32.totalorder %s378_s13, %s378_s13 }
   0x9   :  { %p385_p3 = por %p384_p2, %p383_p1 }
   0xb   :  { %p386_p4 = pnand %p385_p3, %p379_p0 }
   0xd   :  { %389 = shalt.err (!%p386_p4)
}
   0xe   :  { %s415_s14 = smov 256   ;;  %s416_s15 = smov 16  }
   0xf   :  { %33 = dma.hbm_to_vmem [thread:$0]  %s507_s2, 1024, %s28_s12, [#allocation4], %s415_s14, %s415_s14, %s416_s15  }
  0x10   :  { %s417_s8 = smov [#allocation5]  }
  0x11   :  { %s41_s18 = sshll.u32 %s417_s8, 4  ;;  %s42_s18 = int_to_ptr.vmem [resolvable:$true] %s41_s18 }
  0x12   :  { %s398_s19 = scalar_lea.vmem %s42_s18, 4096  ;;  %p403_p6 = scmp.lt.s32.totalorder %s42_s18, %s42_s18 }
  0x13   :  { %p399_p5 = scmp.ne.s32.totalorder %s42_s18, %s398_s19  ;;  %p404_p7 = scmp.lt.s32.totalorder %s398_s19, %s398_s19 }
  0x15   :  { %p405_p8 = por %p404_p7, %p403_p6 }
  0x17   :  { %p406_p9 = pnand %p405_p8, %p399_p5 }
  0x19   :  { %409 = shalt.err (!%p406_p9)
}
  0x1a   :  { %s418_s20 = smov 128   ;;  %s419_s21 = smov 8  }
  0x1b   :  { %47 = dma.hbm_to_vmem [thread:$0]  %s509_s4, 4096, %s42_s18, [#allocation6], %s418_s20, %s418_s20, %s419_s21  }
  0x1c   :  { %410 = dma.done.wait [#allocation4], 1024  }
  0x1d   :  { %411 = vsyncadd [#allocation4], 4294966272 }
  0x1e   :  { %412 = dma.done.wait [#allocation6], 4096  }
  0x1f   :  { %413 = vsyncadd [#allocation6], 4294963200  ;;  %v420_v1 = vmov 0.0   ;;  %v71_v2 = vld [vmem:[#allocation3 + $0x38] sm:$0xff]  ;;  %v70_v3 = vld [vmem:[#allocation3 + $0x30] sm:$0xff]  ;;  %vm84_vm0 = vcmask 261120   ;;  %v74_v0 = vlaneseq }
  0x20   :  { %152 = vmatprep.mubr.f32.mxu0 %v420_v1  ;;  %v69_v4 = vld [vmem:[#allocation3 + $0x28] sm:$0xff]  ;;  %112 = vmatprep.subr.mxu0 %v71_v2  ;;  %v68_v5 = vld [vmem:[#allocation3 + $0x20] sm:$0xff]  ;;  %v67_v6 = vld [vmem:[#allocation3 + $0x18] sm:$0xff]  ;;  %v421_v60 = vmov 0   ;;  %v422_v61 = vmov 2   ;;  %v423_v62 = vmov 1  }
  0x21   :  { %113 = vmatpush1.msra.mxu0 %v70_v3  ;;  %v66_v7 = vld [vmem:[#allocation3 + $0x10] sm:$0xff]  ;;  %v65_v8 = vld [vmem:[#allocation3 + $0x8] sm:$0xff]  ;;  %v64_v9 = vld [vmem:[#allocation3] sm:$0xff]  ;;  %365 = vset.pattern.permute.xlu0 %v421_v60  ;;  %v424_v63 = vmov 3   ;;  %v75_v1 = vshrl.u32 %v74_v0, 7  ;;  %vm320_vm1 = vcmask 7168  }
  0x22   :  { %114 = vmatprep.subr.mxu0 %v69_v4  ;;  %v193_v10 = vld [vmem:[#allocation5 + $0xf0] sm:$0xff]  ;;  %v194_v11 = vld [vmem:[#allocation5 + $0xf8] sm:$0xff]  ;;  %v191_v15 = vld [vmem:[#allocation5 + $0xe0] sm:$0xff]  ;;  %367 = vset.pattern.permute.xlu1 %v422_v61 }
  0x23   :  { %v177_v12 = vld [vmem:[#allocation5 + $0x70] sm:$0xff]  ;;  %115 = vmatpush1.msra.mxu0 %v68_v5  ;;  %v210_v13 = vpack.c.bf16 %v194_v11, %v193_v10  ;;  %v178_v14 = vld [vmem:[#allocation5 + $0x78] sm:$0xff]  ;;  %v192_v16 = vld [vmem:[#allocation5 + $0xe8] sm:$0xff]  ;;  %v76_v2 = vsub.s32 0, %v75_v1  ;;  %v80_v4 = vsub.s32 1, %v75_v1 }
  0x24   :  { %116 = vmatprep.subr.mxu0 %v67_v6  ;;  %v202_v17 = vpack.c.bf16 %v178_v14, %v177_v12  ;;  %v209_v18 = vpack.c.bf16 %v192_v16, %v191_v15  ;;  %v175_v19 = vld [vmem:[#allocation5 + $0x60] sm:$0xff]  ;;  %v176_v20 = vld [vmem:[#allocation5 + $0x68] sm:$0xff]  ;;  %v189_v21 = vld [vmem:[#allocation5 + $0xd0] sm:$0xff] }
  0x25   :  { %117 = vmatpush1.msra.mxu0 %v66_v7  ;;  %v63_v22 = vld [vmem:[%s505_s0] sm:$0xff]  ;;  %332 = vmatprep.subr.bf16.mxu1 %v210_v13  ;;  %v201_v24 = vpack.c.bf16 %v176_v20, %v175_v19  ;;  %v173_v26 = vld [vmem:[#allocation5 + $0x50] sm:$0xff]  ;;  %v188_v29 = vld [vmem:[#allocation5 + $0xc8] sm:$0xff] }
  0x26   :  { %v190_v23 = vld [vmem:[#allocation5 + $0xd8] sm:$0xff]  ;;  %118 = vmatprep.subr.mxu0 %v65_v8  ;;  %333 = vmatpush3.bf16.msra.mxu1 %v202_v17  ;;  %v187_v28 = vld [vmem:[#allocation5 + $0xc0] sm:$0xff]  ;;  %v172_v33 = vld [vmem:[#allocation5 + $0x48] sm:$0xff] }
  0x27   :  { %119 = vmatpush1.msra.mxu0 %v64_v9  ;;  %334 = vmatprep.subr.bf16.mxu1 %v209_v18  ;;  %v208_v25 = vpack.c.bf16 %v190_v23, %v189_v21  ;;  %v174_v27 = vld [vmem:[#allocation5 + $0x58] sm:$0xff]  ;;  %v207_v31 = vpack.c.bf16 %v188_v29, %v187_v28  ;;  %v171_v32 = vld [vmem:[#allocation5 + $0x40] sm:$0xff]  ;;  %v185_v34 = vld [vmem:[#allocation5 + $0xb0] sm:$0xff]  ;;  %v286_v18 = vsub.s32 2, %v75_v1 }
  0x28   :  { %328 = vmatmul.mubr.msk.f32.vlgmr.msra.gmra.mxu0 %vm84_vm0, %v63_v22  ;;  %v200_v30 = vpack.c.bf16 %v174_v27, %v173_v26  ;;  %v186_v35 = vld [vmem:[#allocation5 + $0xb8] sm:$0xff]  ;;  %v199_v36 = vpack.c.bf16 %v172_v33, %v171_v32  ;;  %v169_v38 = vld [vmem:[#allocation5 + $0x30] sm:$0xff]  ;;  %v183_v40 = vld [vmem:[#allocation5 + $0xa0] sm:$0xff] }
  0x29   :  { %v206_v37 = vpack.c.bf16 %v186_v35, %v185_v34  ;;  %v170_v39 = vld [vmem:[#allocation5 + $0x38] sm:$0xff]  ;;  %v184_v41 = vld [vmem:[#allocation5 + $0xa8] sm:$0xff]  ;;  %v167_v44 = vld [vmem:[#allocation5 + $0x20] sm:$0xff] }
  0x2a   :  { %335 = vmatpush3.bf16.msra.mxu1 %v201_v24  ;;  %v198_v42 = vpack.c.bf16 %v170_v39, %v169_v38  ;;  %v205_v43 = vpack.c.bf16 %v184_v41, %v183_v40  ;;  %v168_v45 = vld [vmem:[#allocation5 + $0x28] sm:$0xff]  ;;  %v181_v47 = vld [vmem:[#allocation5 + $0x90] sm:$0xff]  ;;  %v182_v48 = vld [vmem:[#allocation5 + $0x98] sm:$0xff] }
  0x2b   :  { %336 = vmatprep.subr.bf16.mxu1 %v208_v25  ;;  %v197_v46 = vpack.c.bf16 %v168_v45, %v167_v44  ;;  %v204_v49 = vpack.c.bf16 %v182_v48, %v181_v47  ;;  %v165_v50 = vld [vmem:[#allocation5 + $0x10] sm:$0xff]  ;;  %v166_v51 = vld [vmem:[#allocation5 + $0x18] sm:$0xff]  ;;  %v179_v53 = vld [vmem:[#allocation5 + $0x80] sm:$0xff]  ;;  %v296_v25 = vsub.s32 3, %v75_v1 }
  0x2c   :  { %v196_v52 = vpack.c.bf16 %v166_v51, %v165_v50  ;;  %v180_v54 = vld [vmem:[#allocation5 + $0x88] sm:$0xff]  ;;  %v163_v56 = vld [vmem:[#allocation5] sm:$0xff]  ;;  %v329_v33 = vld [vmem:[%s511_s6] ss:$0 sm:$0xff] }
  0x2d   :  { %v203_v55 = vpack.c.bf16 %v180_v54, %v179_v53  ;;  %v164_v57 = vld [vmem:[#allocation5 + $0x8] sm:$0xff]  ;;  %v258_v59 = vld [vmem:[%s506_s1] sm:$0xff] }
  0x2e   :  { %337 = vmatpush3.bf16.msra.mxu1 %v200_v30  ;;  %v195_v58 = vpack.c.bf16 %v164_v57, %v163_v56  ;;  %262 = vperm.xlu0 %365, %v258_v59   ;;  %v72_v3 = vld [vmem:[%s508_s3] sm:$0x3] }
  0x2f   :  { %338 = vmatprep.subr.bf16.mxu1 %v207_v31  ;;  %281 = vperm.xlu1 %367, %v258_v59   ;;  %v77_v5 = vrot.slane %v72_v3, %v76_v2  ;;  %v81_v6 = vrot.slane %v72_v3, %v80_v4  ;;  %v259_v16 = vld [vmem:[%s510_s5] sm:$0xf] }
  0x30   :  { %v268_v17 = vrot.slane %v259_v16, %v76_v2  ;;  %v277_v19 = vrot.slane %v259_v16, %v80_v4  ;;  %v287_v23 = vrot.slane %v259_v16, %v286_v18  ;;  %v297_v28 = vrot.slane %v259_v16, %v296_v25  ;;  %v330_v41 = vld [vmem:[%s512_s7] ss:$0 sm:$0xff] }
  0x31   :  { %v331_v44 = vld [vmem:[#allocation2] ss:$0 sm:$0xff] }
  0x32   :  { %339 = vmatpush3.bf16.msra.mxu1 %v199_v36  ;;  %366 = vset.pattern.permute.xlu0 %v423_v62 }
  0x33   :  { %340 = vmatprep.subr.bf16.mxu1 %v206_v37  ;;  %368 = vset.pattern.permute.xlu1 %v424_v63 }
  0x34   :  { %271 = vperm.xlu0 %366, %v258_v59   ;;  %291 = vperm.xlu1 %368, %v258_v59  }
  0x36   :  { %341 = vmatpush3.bf16.msra.mxu1 %v198_v42 }
  0x37   :  { %342 = vmatprep.subr.bf16.mxu1 %v205_v43 }
  0x38   :  { %369 = vset.pattern.permute.xlu0 %v424_v63 }
  0x3a   :  { %343 = vmatpush3.bf16.msra.mxu1 %v197_v46 }
  0x3b   :  { %344 = vmatprep.subr.bf16.mxu1 %v204_v49 }
  0x3e   :  { %345 = vmatpush3.bf16.msra.mxu1 %v196_v52 }
  0x3f   :  { %346 = vmatprep.subr.bf16.mxu1 %v203_v55 }
  0x42   :  { %347 = vmatpush3.bf16.msra.mxu1 %v195_v58 }
  0xa9   :  { %v263_v15 = vpop.permute.xlu0 %262 }
  0xaa   :  { %v282_v21 = vpop.permute.xlu1 %281  ;;  %v269_v22 = vmul.f32 %v268_v17, %v263_v15 }
  0xab   :  { %v288_v26 = vmul.f32 %v287_v23, %v282_v21 }
  0xaf   :  { %v272_v20 = vpop.permute.xlu0 %271  ;;  %v292_v29 = vpop.permute.xlu1 %291 }
  0xb0   :  { %v278_v24 = vmul.f32 %v277_v19, %v272_v20  ;;  %v298_v32 = vmul.f32 %v297_v28, %v292_v29 }
  0xb2   :  { %v279_v27 = vadd.f32 %v278_v24, %v269_v22 }
  0xb4   :  { %v289_v31 = vadd.f32 %v288_v26, %v279_v27 }
  0xb6   :  { %v299_v37 = vadd.f32 %v298_v32, %v289_v31 }
  0xe8   :  { %v154_v7 = vpop.f32.mrf.mxu0 }
  0xe9   :  { %v155_v8 = vadd.f32 %v154_v7, %v77_v5 }
  0xea   :  { %v156_v9 = vpop.f32.mrf.mxu0 }
  0xeb   :  { %v157_v10 = vadd.f32 %v156_v9, %v81_v6  ;;  %v159_v11 = vmax.f32 %v155_v8, 0.0 }
  0xed   :  { %v160_v12 = vmax.f32 %v157_v10, 0.0  ;;  %v161_v14 = vpack.c.bf16 %v159_v11, %v159_v11 }
  0xef   :  { %v162_v13 = vpack.c.bf16 %v160_v12, %v160_v12 }
  0xf1   :  { %250 = vmatprep.mubr.bf16.mxu1 %v162_v13 }
  0xf2   :  { %251 = vmatmul.mubr.bf16.vlgmr.msra.gmra.mxu1 %v161_v14 }
 0x1b2   :  { %v348_v30 = vpop.f32.mrf.mxu1 }
 0x1b4   :  { %v349_v34 = vpop.f32.mrf.mxu1 }
 0x1b5   :  { %v350_v35 = vadd.f32 %v349_v34, %v348_v30 }
 0x1b6   :  { %v351_v36 = vpop.f32.mrf.mxu1 }
 0x1b7   :  { %v253_v38 = vadd.f32 %v350_v35, %v329_v33 }
 0x1b8   :  { %v352_v39 = vpop.f32.mrf.mxu1 }
 0x1b9   :  { %v300_v40 = vadd.f32 %v299_v37, %v253_v38 }
 0x1bb   :  { %v301_v42 = vmax.f32 %v300_v40, 0.0 }
 0x1bd   :  { %v309_v43 = vmul.f32 %v330_v41, %v301_v42 }
 0x1bf   :  { %310 = vadd.xlane.f32.xlu1 %v309_v43 }
 0x248   :  { %v311_v45 = vpop.xlane.xlu1 %310 }
 0x249   :  { %v319_v46 = vadd.f32 %v331_v44, %v311_v45 }
 0x24b   :  { %321 = vst.msk [vmem:[%s514_s9] sm:$0xff] %vm320_vm1, %v319_v46 }
 0x24c   :  { %326 = vsyncpa [#allocation4], 1 }
 0x24d   :  { %327 = vsyncpa [#allocation6], 1 }

</bundles_post_ra>
